<compile_context>
chip_gen: v7x
topology: tpu7x:2x2x1
jax: 0.10.0
libtpu: 0.0.40
codegen_flags: <defaults>
</compile_context>

<pallas_src>
import functools

import jax
import jax.numpy as jnp
from jax.experimental import pallas as pl
from jax.experimental.pallas import tpu as pltpu


def _mlp_kernel_o1(x_ref, w1_ref, b1_ref, w2_ref, b2_ref, o_ref):
    """output_size == 1 path.

    x_ref: (tb, E); w1_ref: (E, E); b1_ref: (1, E); w2_ref: (1, E); b2_ref: (1, 1).
    fc1 on the MXU (f32 accumulate), bias+ReLU on the VPU in f32, fc2 as an
    elementwise multiply (VPU) + cross-lane sum (XLU) -- no second MXU pass,
    no downcast of h.
    """
    h = jnp.dot(x_ref[...], w1_ref[...], preferred_element_type=jnp.float32)
    h = jnp.maximum(h + b1_ref[...].astype(jnp.float32), 0.0)
    w2 = w2_ref[...].astype(jnp.float32)                       # (1, E) broadcast
    out = jnp.sum(h * w2, axis=-1, keepdims=True)
    out = out + b2_ref[...].astype(jnp.float32)
    o_ref[...] = out.astype(o_ref.dtype)


def _mlp_kernel_general(x_ref, w1_ref, b1_ref, w2_ref, b2_ref, o_ref):
    """General output_size path: both layers on the MXU, h kept in f32."""
    h = jnp.dot(x_ref[...], w1_ref[...], preferred_element_type=jnp.float32)
    h = jnp.maximum(h + b1_ref[...].astype(jnp.float32), 0.0)
    out = jnp.dot(h, w2_ref[...].astype(jnp.float32),
                  preferred_element_type=jnp.float32)
    out = out + b2_ref[...].astype(jnp.float32)
    o_ref[...] = out.astype(o_ref.dtype)


@functools.partial(jax.jit, static_argnames=("block_b", "compute_dtype"))
def kantorovich_forward(x, w1_t, b1, w2_t, b2, *, block_b=256,
                        compute_dtype=None):
    """Fused forward pass of KantorovichNetwork.

    x:    (B, E) activations.
    w1_t: (E, E) fc1 weight, pre-transposed to (in, out).
    b1:   (1, E) fc1 bias.
    w2_t: (E, O) fc2 weight, pre-transposed to (in, out).
    b2:   (1, O) fc2 bias.
    block_b:       batch tile (multiple of 8; sweep 256/512).
    compute_dtype: if set (e.g. jnp.bfloat16) x and W1 are cast for the fc1
                   matmul (f32 accumulation); fc2 weights, biases and the
                   output stay f32.
    """
    B, E = x.shape
    O = w2_t.shape[1]
    assert block_b % 8 == 0, "block_b must be a multiple of 8"

    if compute_dtype is not None:
        x = x.astype(compute_dtype)
        w1_t = w1_t.astype(compute_dtype)

    # Batch tile: as large as block_b allows; for very large B keep >= 2 grid
    # steps so the 'parallel' axis can be sharded across v7x's 2 TensorCores.
    bb = min(block_b, B)
    if bb == B and B >= 512 and (B // 2) % 8 == 0:
        bb = B // 2
    grid = (pl.cdiv(B, bb),)

    if O == 1:
        kernel = _mlp_kernel_o1
        w2_arg = w2_t.reshape(1, E)                 # (1, E) row for VPU path
        w2_spec = pl.BlockSpec((1, E), lambda i: (0, 0))
    else:
        kernel = _mlp_kernel_general
        w2_arg = w2_t
        w2_spec = pl.BlockSpec((E, O), lambda i: (0, 0))

    itemsize = jnp.dtype(x.dtype).itemsize
    cost = pl.CostEstimate(
        flops=2 * B * E * (E + O),
        transcendentals=0,
        bytes_accessed=(B * E * itemsize + E * E * itemsize
                        + E * O * 4 + E * 4 + O * 4 + B * O * 4),
    )

    return pl.pallas_call(
        kernel,
        out_shape=jax.ShapeDtypeStruct((B, O), jnp.float32),
        grid_spec=pltpu.PrefetchScalarGridSpec(
            num_scalar_prefetch=0,
            grid=grid,
            in_specs=[
                pl.BlockSpec((bb, E), lambda i: (i, 0)),   # x batch tile
                pl.BlockSpec((E, E), lambda i: (0, 0)),    # W1^T, resident
                pl.BlockSpec((1, E), lambda i: (0, 0)),    # b1, resident
                w2_spec,                                   # W2, resident
                pl.BlockSpec((1, O), lambda i: (0, 0)),    # b2, resident
            ],
            out_specs=pl.BlockSpec((bb, O), lambda i: (i, 0)),
        ),
        compiler_params=pltpu.CompilerParams(
            dimension_semantics=("parallel",)),
        cost_estimate=cost,
    )(x, w1_t, b1, w2_arg, b2)


def init_params(key, embeddings_size=128, output_size=1, dtype=jnp.float32):
    """Deterministic init mimicking nn.Linear (uniform +/- 1/sqrt(fan_in)).

    Weights are returned pre-transposed to (in, out) for the kernel."""
    k1, k2, k3, k4 = jax.random.split(key, 4)
    bound1 = 1.0 / jnp.sqrt(embeddings_size)
    w1_t = jax.random.uniform(k1, (embeddings_size, embeddings_size),
                              dtype, -bound1, bound1)
    b1 = jax.random.uniform(k2, (1, embeddings_size), dtype, -bound1, bound1)
    bound2 = 1.0 / jnp.sqrt(embeddings_size)
    w2_t = jax.random.uniform(k3, (embeddings_size, output_size),
                              dtype, -bound2, bound2)
    b2 = jax.random.uniform(k4, (1, output_size), dtype, -bound2, bound2)
    return w1_t, b1, w2_t, b2


def reference_forward(x, w1_t, b1, w2_t, b2):
    h = jnp.maximum(x @ w1_t + b1, 0.0)
    return h @ w2_t + b2


if __name__ == "__main__":
    key = jax.random.PRNGKey(0)
    kx, kp = jax.random.split(key)

    # Small but non-trivial: B=384 with block_b=256 gives a 2-step grid and a
    # partial last batch tile (exercises output masking). E=128 is the module
    # default embeddings_size, O=1 the default output_size.
    B, E, O = 384, 128, 1
    x = jax.random.normal(kx, (B, E), jnp.float32)
    w1_t, b1, w2_t, b2 = init_params(kp, embeddings_size=E, output_size=O)

    ref = reference_forward(x, w1_t, b1, w2_t, b2)

    # f32 path (matches PyTorch float32 semantics).
    out = kantorovich_forward(x, w1_t, b1, w2_t, b2, block_b=256)
    out = jax.block_until_ready(out)
    assert out.shape == (B, O), out.shape
    assert jnp.allclose(out, ref, atol=1e-4, rtol=1e-4), (
        float(jnp.max(jnp.abs(out - ref))))

    # bf16 fc1 path (halves x HBM traffic, full-rate MXU); looser tolerance.
    out_bf16 = kantorovich_forward(x, w1_t, b1, w2_t, b2, block_b=256,
                                   compute_dtype=jnp.bfloat16)
    out_bf16 = jax.block_until_ready(out_bf16)
    assert out_bf16.shape == (B, O), out_bf16.shape
    assert jnp.allclose(out_bf16, ref, atol=5e-2, rtol=5e-2), (
        float(jnp.max(jnp.abs(out_bf16 - ref))))

    print("KERNEL_OK")
</pallas_src>

<mosaic_0001>
module attributes {stable_mosaic.version = 11 : i64} {
  func.func @_mlp_kernel_o1(%arg0: i32, %arg1: memref<256x128xf32, #tpu.memory_space<vmem>>, %arg2: memref<128x128xf32, #tpu.memory_space<vmem>>, %arg3: memref<1x128xf32, #tpu.memory_space<vmem>>, %arg4: memref<1x128xf32, #tpu.memory_space<vmem>>, %arg5: memref<1x1xf32, #tpu.memory_space<vmem>>, %arg6: memref<256x1xf32, #tpu.memory_space<vmem>>) attributes {dimension_semantics = [#tpu.dimension_semantics<parallel>], iteration_bounds = array<i64: 2>, scalar_prefetch = 0 : i64, scratch_operands = 0 : i64, tpu.core_type = #tpu.core_type<tc>, window_params = [{transform_indices = @transform_0, window_bounds = array<i64: 256, 128>}, {pipeline_mode = #tpu.pipeline_mode<synchronous>, transform_indices = @transform_1, window_bounds = array<i64: 128, 128>}, {pipeline_mode = #tpu.pipeline_mode<synchronous>, transform_indices = @transform_2, window_bounds = array<i64: 1, 128>}, {pipeline_mode = #tpu.pipeline_mode<synchronous>, transform_indices = @transform_3, window_bounds = array<i64: 1, 128>}, {pipeline_mode = #tpu.pipeline_mode<synchronous>, transform_indices = @transform_4, window_bounds = array<i64: 1, 1>}, {transform_indices = @transform_5, window_bounds = array<i64: 256, 1>}]} {
    %c0 = arith.constant 0 : index
    %c0_0 = arith.constant 0 : index
    %0 = vector.load %arg1[%c0, %c0_0] : memref<256x128xf32, #tpu.memory_space<vmem>>, vector<256x128xf32>
    %c0_1 = arith.constant 0 : index
    %c0_2 = arith.constant 0 : index
    %1 = vector.load %arg2[%c0_1, %c0_2] : memref<128x128xf32, #tpu.memory_space<vmem>>, vector<128x128xf32>
    %cst = arith.constant dense<0.000000e+00> : vector<256x128xf32>
    %2 = tpu.matmul %0, %1, %cst {dimension_numbers = #tpu.dot_dimension_numbers<[1], [0], [0], [1], [0, 0, 1, 1], [], []>} : vector<256x128xf32>, vector<128x128xf32>, vector<256x128xf32> -> vector<256x128xf32>
    %c0_3 = arith.constant 0 : index
    %c0_4 = arith.constant 0 : index
    %3 = vector.load %arg3[%c0_3, %c0_4] : memref<1x128xf32, #tpu.memory_space<vmem>>, vector<1x128xf32>
    %4 = vector.broadcast %3 : vector<1x128xf32> to vector<256x128xf32>
    %5 = arith.addf %2, %4 : vector<256x128xf32>
    %cst_5 = arith.constant 0.000000e+00 : f32
    %6 = vector.broadcast %cst_5 : f32 to vector<256x128xf32>
    %7 = arith.maximumf %5, %6 : vector<256x128xf32>
    %c0_6 = arith.constant 0 : index
    %c0_7 = arith.constant 0 : index
    %8 = vector.load %arg4[%c0_6, %c0_7] : memref<1x128xf32, #tpu.memory_space<vmem>>, vector<1x128xf32>
    %9 = vector.broadcast %8 : vector<1x128xf32> to vector<256x128xf32>
    %10 = arith.mulf %7, %9 : vector<256x128xf32>
    %cst_8 = arith.constant dense<0.000000e+00> : vector<256xf32>
    %11 = vector.multi_reduction <add>, %10, %cst_8 [1] : vector<256x128xf32> to vector<256xf32>
    %12 = vector.shape_cast %11 : vector<256xf32> to vector<256x1xf32>
    %c0_9 = arith.constant 0 : index
    %c0_10 = arith.constant 0 : index
    %13 = vector.load %arg5[%c0_9, %c0_10] : memref<1x1xf32, #tpu.memory_space<vmem>>, vector<1x1xf32>
    %14 = vector.broadcast %13 : vector<1x1xf32> to vector<256x1xf32>
    %15 = arith.addf %12, %14 : vector<256x1xf32>
    %c0_11 = arith.constant 0 : index
    %c0_12 = arith.constant 0 : index
    %16 = vector.load %arg6[%c0_11, %c0_12] : memref<256x1xf32, #tpu.memory_space<vmem>>, vector<256x1xf32>
    tpu.vector_store %arg6[%c0_11, %c0_12], %15 {strides = array<i32>} : memref<256x1xf32, #tpu.memory_space<vmem>>, vector<256x1xf32>,
    return
  }
  func.func @transform_0(%arg0: i32) -> (i32, i32) {
    %c0_i32 = arith.constant 0 : i32
    %c0_i32_0 = arith.constant 0 : i32
    return %arg0, %c0_i32 : i32, i32
  }
  func.func @transform_1(%arg0: i32) -> (i32, i32) {
    %c0_i32 = arith.constant 0 : i32
    %c0_i32_0 = arith.constant 0 : i32
    %c0_i32_1 = arith.constant 0 : i32
    return %c0_i32, %c0_i32_0 : i32, i32
  }
  func.func @transform_2(%arg0: i32) -> (i32, i32) {
    %c0_i32 = arith.constant 0 : i32
    %c0_i32_0 = arith.constant 0 : i32
    %c0_i32_1 = arith.constant 0 : i32
    return %c0_i32, %c0_i32_0 : i32, i32
  }
  func.func @transform_3(%arg0: i32) -> (i32, i32) {
    %c0_i32 = arith.constant 0 : i32
    %c0_i32_0 = arith.constant 0 : i32
    %c0_i32_1 = arith.constant 0 : i32
    return %c0_i32, %c0_i32_0 : i32, i32
  }
  func.func @transform_4(%arg0: i32) -> (i32, i32) {
    %c0_i32 = arith.constant 0 : i32
    %c0_i32_0 = arith.constant 0 : i32
    %c0_i32_1 = arith.constant 0 : i32
    return %c0_i32, %c0_i32_0 : i32, i32
  }
  func.func @transform_5(%arg0: i32) -> (i32, i32) {
    %c0_i32 = arith.constant 0 : i32
    %c0_i32_0 = arith.constant 0 : i32
    return %arg0, %c0_i32 : i32, i32
  }
}

</mosaic_0001>

<bundles_post_ra>
// kernel: kantorovich_forward.1
= control target key start
LH: loop header
LB: loop body
LE: loop exit
PB: predicated region body
PF: predicated region fallthrough
CT: control target
= control target key end

     0   :  { %s2135_s0 = inlined_call_operand.hbm [shape: f32[384,128], index: 0, kind: input, shape index: {}]   ;;  %s2136_s1 = inlined_call_operand.hbm [shape: f32[128,128], index: 1, kind: input, shape index: {}]   ;;  %s2137_s2 = inlined_call_operand.vmem [shape: f32[1,128], index: 2, kind: input, shape index: {}]   ;;  %s2138_s3 = inlined_call_operand.vmem [shape: f32[1,128], index: 3, kind: input, shape index: {}]   ;;  %s2139_s4 = inlined_call_operand.<no memory space> [shape: f32[1,1], index: 4, kind: input, shape index: {}]   ;;  %s2140_s5 = inlined_call_operand.vmem [shape: f32[384,1], index: 5, kind: output, shape index: {}]  }
   0x1   :  { %v10_v0 = vstv %s2139_s4 }
   0x2   :  { %11 = vst [vmem:[#allocation2] sm:$0x1] %v10_v0 }
   0x3   :  { %12 = vsyncpa [#allocation4], 0 }
   0x4   :  { %14 = vsyncpa [#allocation4 + $0x1], 0 }
   0x5   :  { %15 = vsyncpa [#allocation6], 0  ;;  %s1645_s20 = smov 0   ;;  %s1647_s21 = smov 0  }
   0x6   :  { %s1649_s22 = smov 0   ;;  %s1651_s23 = smov 0  }
   0x7 LB: > { %s1664_s4 = sadd.s32 4294967295, %s1572_s23   ;;  %s1667_s24 = sadd.s32 1, %s1572_s23   ;;  %s1572_s23 = sphi %s1651_s23, %s2163_s23   ;;  %s1568_s22 = sphi %s1649_s22, %s2162_s22   ;;  %s1564_s21 = sphi %s1647_s21, %s2161_s21   ;;  %s1560_s20 = sphi %s1645_s20, %s2160_s20  }
   0x8   : > { %s25_s25 = ssub.s32 %s1572_s23, %s1667_s24  ;;  %s28_s26 = sadd.s32 1, %s1568_s22 }
   0x9   : > { %p26_p0 = scmp.eq.s32.totalorder %s25_s25, 0  ;;  %p35_p1 = scmp.ne.s32.totalorder %s1568_s22, %s1564_s21 }
   0xa   : > { %p36_p2 = scmp.eq.s32.totalorder %s1572_s23, 0  ;;  %p41_p3 = scmp.ne.s32.totalorder %s1564_s21, %s1560_s20 }
   0xb   : > { %s1677_s27 = scalar_select %p26_p0, %s1568_s22, %s28_s26  }
   0xc   : > { %p1679_p4 = por %p36_p2, %p35_p1  ;;  %p2141_p5 = scmp.eq.s32.totalorder %s1664_s4, 0 }
   0xd   : > { %p149_p6 = scmp.eq.s32.totalorder %s1664_s4, 1  ;;  %p1120_p7 = scmp.ge.s32.totalorder %s1572_s23, 1 }
   0xe   : > { %s2144_s28 = scalar_select %p1679_p4, 1, 0 }
   0xf   : > { %p1688_p8 = por %p2141_p5, %p41_p3  ;;  %p162_p9 = scmp.lt.s32.totalorder %s1572_s23, 3 }
  0x10   : > { %p1693_p10 = por %p149_p6, %p35_p1  ;;  %s1606_s7 = smov [#allocation5]  }
  0x11   : > { %s2145_s29 = scalar_select %p1688_p8, 1, 0 }
  0x12   : > { %s2146_s30 = scalar_select %p1693_p10, 1, 0 }
  0x13   : > { %p1697_p11 = pnand %p1120_p7, %p162_p9  ;;  %s174_s8 = sshll.u32 %s1606_s7, 4  ;;  %s175_s8 = int_to_ptr.vmem [resolvable:$true] %s174_s8 }
  0x14   : > { %s1446_s12 = scalar_lea.hbm %s2136_s1, 2048 }
  0x15   : > { %s2147_s6 = scalar_select %p1697_p11, 1, 0 }
  0x16   : > { %p1339_p12 = pneg %p1697_p11  ;;  %p1447_p0 = scmp.ne.s32.totalorder %s2136_s1, %s1446_s12 }
  0x17   : > { %p1453_p6 = scmp.lt.u32.totalorder %s1446_s12, %s2136_s1 }
  0x18   : > { %p1705_p13 = pnand %p1339_p12, %p2141_p5 }
  0x1a   : > { %p1448_p1 = pneg %p1705_p13 }
  0x1c   : > { %p1449_p2 = pnand %p1448_p1, %p1447_p0 }
  0x1e   : > { %p1450_p3 = pneg %p1449_p2 }
  0x20   : > { %p1455_p7 = pnand %p1453_p6, %p1450_p3 }
  0x22   : > { %1458 = shalt.err (!%p1455_p7)
}
  0x23   : > { %s1459_s17 = scalar_lea.vmem %s175_s8, 2048  ;;  %p1467_p10 = scmp.lt.s32.totalorder %s175_s8, %s175_s8 }
  0x24   : > { %p1460_p9 = scmp.ne.s32.totalorder %s175_s8, %s1459_s17  ;;  %p1468_p8 = scmp.lt.s32.totalorder %s1459_s17, %s1459_s17 }
  0x26   : > { %p1462_p12 = pnand %p1460_p9, %p1448_p1  ;;  %p1469_p11 = por %p1468_p8, %p1467_p10 }
  0x28   : > { %p1463_p5 = pneg %p1462_p12 }
  0x2a   : > { %p1470_p4 = pnand %p1469_p11, %p1463_p5 }
  0x2c   : > { %1473 = shalt.err (!%p1470_p4)
}
  0x2d   : > { %s1607_s18 = smov 128   ;;  %s1608_s19 = smov 8  }
  0x2e   : > { %1342 = dma.hbm_to_vmem [thread:$0]  (!%p1705_p13), %s2136_s1, 2048, %s175_s8, [#allocation6], %s1607_s18, %s1607_s18, %s1608_s19  }
  0x2f   : > { %p1122_p0 = scmp.ge.s32.totalorder %s1572_s23, 2 }
  0x30   : > { %p2149_p2 = scmp.ne.s32.totalorder (!%p1122_p0), %s2144_s28, 0 }
  0x31   : > { %193 = sbr.rel (%p1122_p0) target bundleno = 91 (0x5b), region = 32 }
  0x38   : > { %196 = sbr.rel (!%p2149_p2) target bundleno = 91 (0x5b), region = 36  ;;  %s197_s26 = sand.u32 (%p2149_p2), 1, %s1568_s22  }
  0x39   : > { %s1124_s7 = sshll.u32 (%p2149_p2), %s1572_s23, 5  ;;  %s1123_s10 = sshll.u32 (%p2149_p2), %s197_s26, 8 }
  0x3a   : > { %s203_s11 = ssub.s32 (%p2149_p2), 48, %s1124_s7  ;;  %s1733_s13 = scalar_lea.sflag (%p2149_p2), [#allocation4], %s197_s26 }
  0x3b   : > { %p204_p4 = scmp.lt.s32.totalorder (%p2149_p2), %s203_s11, 32  ;;  %s201_s8 = scalar_lea.vmem (%p2149_p2), [#allocation3], %s1123_s10 }
  0x3f   : > { %s2165_s11 = smov (!%p204_p4, %s203_s11), 32 }
  0x40   : > { %s1730_s12 = sshll.u32 %s2165_s11, 7 }
  0x41   : > { %s208_s9 = ssub.s32 4096, %s1730_s12 }
  0x42   : > { %209 = vsyncadd %s1733_s13, %s208_s9  ;;  %p1126_p5 = scmp.ne.s32.totalorder %s1730_s12, 0  ;;  %s1154_s28 = sshll.u32 %s1572_s23, 12 }
  0x43   : > { %s1741_s16 = scalar_lea.hbm %s2135_s0, %s1154_s28  ;;  %s214_s17 = sshll.u32 %s201_s8, 4  ;;  %s1743_s17 = int_to_ptr.vmem [resolvable:$true] %s214_s17 }
  0x44   : > { %s1474_s18 = scalar_lea.hbm %s1741_s16, %s1730_s12  ;;  %s1478_s23 = scalar_lea.hbm %s2135_s0, 6144 }
  0x45   : > { %p1475_p8 = scmp.ne.s32.totalorder %s1741_s16, %s1474_s18  ;;  %p1479_p13 = scmp.lt.u32.totalorder %s1741_s16, %s2135_s0 }
  0x46   : > { %p1480_p1 = scmp.lt.u32.totalorder %s1478_s23, %s1474_s18  ;;  %p1482_p6 = scmp.lt.u32.totalorder %s1474_s18, %s1741_s16 }
  0x47   : > { %p1476_p10 = pnand %p1475_p8, %p1126_p5 }
  0x48   : > { %p1481_p3 = por %p1480_p1, %p1479_p13 }
  0x49   : > { %p1477_p11 = pneg %p1476_p10 }
  0x4a   : > { %p1483_p7 = por %p1482_p6, %p1481_p3 }
  0x4c   : > { %p1484_p9 = pnand %p1483_p7, %p1477_p11 }
  0x4e   : > { %1487 = shalt.err (!%p1484_p9)
}
  0x4f   : > { %s1488_s7 = scalar_lea.vmem %s1743_s17, %s1730_s12  ;;  %s1609_s10 = smov [#allocation3]  }
  0x50   : > { %p1489_p12 = scmp.ne.s32.totalorder %s1743_s17, %s1488_s7  ;;  %s1492_s11 = sshll.u32 %s1609_s10, 4  ;;  %s1493_s11 = int_to_ptr.vmem [resolvable:$false] %s1492_s11 }
  0x51   : > { %s1494_s9 = scalar_lea.vmem %s1493_s11, 8192  ;;  %p1495_p4 = scmp.lt.s32.totalorder %s1743_s17, %s1493_s11 }
  0x52   : > { %p1490_p0 = pnand %p1489_p12, %p1126_p5  ;;  %p1496_p8 = scmp.lt.s32.totalorder %s1494_s9, %s1488_s7 }
  0x54   : > { %p1491_p2 = pneg %p1490_p0  ;;  %p1497_p10 = por %p1496_p8, %p1495_p4 }
  0x56   : > { %p1498_p13 = pnand %p1497_p10, %p1491_p2 }
  0x58   : > { %1501 = shalt.err (!%p1498_p13)
}
  0x59   : > { %s1610_s8 = smov 128   ;;  %s1611_s28 = smov 8  }
  0x5a   : > { %220 = dma.hbm_to_vmem [thread:$0]  (%p1126_p5), %s1741_s16, %s1730_s12, %s1743_s17, %s1733_s13, %s1610_s8, %s1610_s8, %s1611_s28  }
  0x5b PF: > { %p2150_p11 = scmp.ne.s32.totalorder %s2147_s6, 0 }
  0x5c   : > { %s228_s14 = sand.u32 (!%p2150_p11), 1, %s1564_s21   ;;  %p2151_p1 = scmp.ne.s32.totalorder (!%p2150_p11), %s2145_s29, 0 }
  0x5d   : > { %226 = sbr.rel (%p2150_p11) target bundleno = 618 (0x26a), region = 40  ;;  %s1773_s15 = sshll.u32 (!%p2150_p11), %s228_s14, 8 }
  0x5e   : > { %s229_s18 = scalar_lea.sflag (!%p2150_p11), [#allocation4], %s228_s14  ;;  %s1776_s19 = scalar_lea.vmem (!%p2150_p11), [#allocation3], %s1773_s15 }
  0x64   : > { %1551 = dma.done.wait (%p2151_p1), %s229_s18, 4096  }
  0x65   : > { %1553 = vsyncadd (%p2151_p1), %s229_s18, 4294963200  ;;  %p2152_p5 = scmp.eq.s32.totalorder %s1664_s4, 0 }
  0x67   : > { %1555 = dma.done.wait (%p2152_p5), [#allocation6], 2048   ;;  %p2153_p3 = pmov %p2152_p5 }
  0x68   : > { %v304_v1 = vld [vmem:[#allocation5] sm:$0xff]  ;;  %v305_v2 = vld [vmem:[#allocation5 + $0x8] sm:$0xff]  ;;  %v306_v3 = vld [vmem:[#allocation5 + $0x10] sm:$0xff]  ;;  %vm726_vm0 = vcmask 7168   ;;  %s1897_s16 = scalar_lea.vmem [#allocation7], %s1773_s15   ;;  %p2154_p6 = scmp.ne.s32.totalorder %s2146_s30, 0 }
  0x69   : > { %1557 = vsyncadd (%p2153_p3), [#allocation6], 4294965248  ;;  %v1286_v4 = vpack.c.bf16 %v305_v2, %v304_v1  ;;  %v307_v5 = vld [vmem:[#allocation5 + $0x18] sm:$0xff]  ;;  %v308_v7 = vld [vmem:[#allocation5 + $0x20] sm:$0xff]  ;;  %s1138_s17 = sshll.u32 (%p2154_p6), %s1664_s4, 5  ;;  %s1155_s20 = sshll.u32 (%p2154_p6), %s1664_s4, 8 }
  0x6a   : > { %v1290_v6 = vpack.c.bf16 %v307_v5, %v306_v3  ;;  %v309_v8 = vld [vmem:[#allocation5 + $0x28] sm:$0xff]  ;;  %v272_v10 = vld [vmem:[%s1776_s19] sm:$0xff]  ;;  %v310_v12 = vld [vmem:[#allocation5 + $0x30] sm:$0xff]  ;;  %s767_s23 = ssub.s32 (%p2154_p6), 48, %s1138_s17  ;;  %s2000_s7 = scalar_lea.vmem (%p2154_p6), %s2140_s5, %s1155_s20  }
  0x6b   : > { %1287 = vmatprep.subr.bf16.mxu0 %v1286_v4  ;;  %1318 = vmatprep.subr.bf16.mxu1 %v1286_v4  ;;  %v1294_v9 = vpack.c.bf16 %v309_v8, %v308_v7  ;;  %v288_v11 = vld [vmem:[%s1776_s19 + $0x80] sm:$0xff]  ;;  %v311_v13 = vld [vmem:[#allocation5 + $0x38] sm:$0xff]  ;;  %v313_v16 = vld [vmem:[#allocation5 + $0x48] sm:$0xff]  ;;  %p768_p7 = scmp.lt.s32.totalorder (%p2154_p6), %s767_s23, 32 }
  0x6c   : > { %1289 = vmatpush3.bf16.msra.mxu0 %v1286_v4  ;;  %1326 = vmatpush3.bf16.msra.mxu1 %v1286_v4  ;;  %v1298_v14 = vpack.c.bf16 %v311_v13, %v310_v12  ;;  %v312_v15 = vld [vmem:[#allocation5 + $0x40] sm:$0xff]  ;;  %v314_v18 = vld [vmem:[#allocation5 + $0x50] sm:$0xff]  ;;  %v315_v19 = vld [vmem:[#allocation5 + $0x58] sm:$0xff] }
  0x6d   : > { %1291 = vmatprep.subr.bf16.mxu0 %v1290_v6  ;;  %1319 = vmatprep.subr.bf16.mxu1 %v1290_v6  ;;  %v1302_v17 = vpack.c.bf16 %v313_v16, %v312_v15  ;;  %v1306_v20 = vpack.c.bf16 %v315_v19, %v314_v18  ;;  %v316_v21 = vld [vmem:[#allocation5 + $0x60] sm:$0xff]  ;;  %v317_v22 = vld [vmem:[#allocation5 + $0x68] sm:$0xff]  ;;  %v318_v24 = vld [vmem:[#allocation5 + $0x70] sm:$0xff] }
  0x6e   : > { %1238 = vmatprep.mubr.f32.mxu0 %v272_v10  ;;  %1262 = vmatprep.mubr.f32.mxu1 %v288_v11  ;;  %v1310_v23 = vpack.c.bf16 %v317_v22, %v316_v21  ;;  %v319_v25 = vld [vmem:[#allocation5 + $0x78] sm:$0xff]  ;;  %v273_v27 = vld [vmem:[%s1776_s19 + $0x8] sm:$0xff]  ;;  %v274_v29 = vld [vmem:[%s1776_s19 + $0x10] sm:$0xff] }
  0x6f   : > { %v1314_v26 = vpack.c.bf16 %v319_v25, %v318_v24  ;;  %v289_v28 = vld [vmem:[%s1776_s19 + $0x88] sm:$0xff]  ;;  %v290_v30 = vld [vmem:[%s1776_s19 + $0x90] sm:$0xff]  ;;  %v275_v31 = vld [vmem:[%s1776_s19 + $0x18] sm:$0xff] }
  0x70   : > { %1293 = vmatpush3.bf16.msra.mxu0 %v1290_v6  ;;  %1327 = vmatpush3.bf16.msra.mxu1 %v1290_v6  ;;  %v291_v32 = vld [vmem:[%s1776_s19 + $0x98] sm:$0xff]  ;;  %v276_v33 = vld [vmem:[%s1776_s19 + $0x20] sm:$0xff]  ;;  %v277_v35 = vld [vmem:[%s1776_s19 + $0x28] sm:$0xff] }
  0x71   : > { %1295 = vmatprep.subr.bf16.mxu0 %v1294_v9  ;;  %1320 = vmatprep.subr.bf16.mxu1 %v1294_v9  ;;  %v292_v34 = vld [vmem:[%s1776_s19 + $0xa0] sm:$0xff]  ;;  %v293_v36 = vld [vmem:[%s1776_s19 + $0xa8] sm:$0xff]  ;;  %v278_v37 = vld [vmem:[%s1776_s19 + $0x30] sm:$0xff] }
  0x72   : > { %v294_v38 = vld [vmem:[%s1776_s19 + $0xb0] sm:$0xff]  ;;  %v279_v39 = vld [vmem:[%s1776_s19 + $0x38] sm:$0xff]  ;;  %v280_v41 = vld [vmem:[%s1776_s19 + $0x40] sm:$0xff] }
  0x73   : > { %v295_v40 = vld [vmem:[%s1776_s19 + $0xb8] sm:$0xff]  ;;  %v296_v42 = vld [vmem:[%s1776_s19 + $0xc0] sm:$0xff]  ;;  %v281_v43 = vld [vmem:[%s1776_s19 + $0x48] sm:$0xff] }
  0x74   : > { %1297 = vmatpush3.bf16.msra.mxu0 %v1294_v9  ;;  %1328 = vmatpush3.bf16.msra.mxu1 %v1294_v9  ;;  %v297_v44 = vld [vmem:[%s1776_s19 + $0xc8] sm:$0xff]  ;;  %v282_v45 = vld [vmem:[%s1776_s19 + $0x50] sm:$0xff]  ;;  %v283_v47 = vld [vmem:[%s1776_s19 + $0x58] sm:$0xff] }
  0x75   : > { %1299 = vmatprep.subr.bf16.mxu0 %v1298_v14  ;;  %1321 = vmatprep.subr.bf16.mxu1 %v1298_v14  ;;  %v298_v46 = vld [vmem:[%s1776_s19 + $0xd0] sm:$0xff]  ;;  %v299_v48 = vld [vmem:[%s1776_s19 + $0xd8] sm:$0xff]  ;;  %v284_v49 = vld [vmem:[%s1776_s19 + $0x60] sm:$0xff] }
  0x76   : > { %v300_v50 = vld [vmem:[%s1776_s19 + $0xe0] sm:$0xff]  ;;  %v285_v51 = vld [vmem:[%s1776_s19 + $0x68] sm:$0xff]  ;;  %v286_v53 = vld [vmem:[%s1776_s19 + $0x70] sm:$0xff] }
  0x77   : > { %v301_v52 = vld [vmem:[%s1776_s19 + $0xe8] sm:$0xff]  ;;  %v302_v54 = vld [vmem:[%s1776_s19 + $0xf0] sm:$0xff]  ;;  %v287_v55 = vld [vmem:[%s1776_s19 + $0x78] sm:$0xff] }
  0x78   : > { %1301 = vmatpush3.bf16.msra.mxu0 %v1298_v14  ;;  %1329 = vmatpush3.bf16.msra.mxu1 %v1298_v14  ;;  %v303_v56 = vld [vmem:[%s1776_s19 + $0xf8] sm:$0xff] }
  0x79   : > { %1303 = vmatprep.subr.bf16.mxu0 %v1302_v17  ;;  %1322 = vmatprep.subr.bf16.mxu1 %v1302_v17  ;;  %v1821_v57 = vld [vmem:[%s2137_s2] ss:$0 sm:$0xff] }
  0x7a   : > { %v1829_v1 = vld [vmem:[%s2138_s3] ss:$0 sm:$0xff] }
  0x7c   : > { %1305 = vmatpush3.bf16.msra.mxu0 %v1302_v17  ;;  %1330 = vmatpush3.bf16.msra.mxu1 %v1302_v17 }
  0x7d   : > { %1307 = vmatprep.subr.bf16.mxu0 %v1306_v20  ;;  %1323 = vmatprep.subr.bf16.mxu1 %v1306_v20 }
  0x80   : > { %1309 = vmatpush3.bf16.msra.mxu0 %v1306_v20  ;;  %1331 = vmatpush3.bf16.msra.mxu1 %v1306_v20 }
  0x81   : > { %1311 = vmatprep.subr.bf16.mxu0 %v1310_v23  ;;  %1324 = vmatprep.subr.bf16.mxu1 %v1310_v23 }
  0x84   : > { %1313 = vmatpush3.bf16.msra.mxu0 %v1310_v23  ;;  %1332 = vmatpush3.bf16.msra.mxu1 %v1310_v23 }
  0x85   : > { %1315 = vmatprep.subr.bf16.mxu0 %v1314_v26  ;;  %1325 = vmatprep.subr.bf16.mxu1 %v1314_v26 }
  0x88   : > { %1317 = vmatpush3.bf16.msra.mxu0 %v1314_v26  ;;  %1333 = vmatpush3.bf16.msra.mxu1 %v1314_v26 }
  0x8b   : > { %1239 = vmatmul.mubr.f32.vlgmr.msra.gmra.mrb[0].mxu0 %v273_v27  ;;  %1263 = vmatmul.mubr.f32.vlgmr.msra.gmra.mrb[0].mxu1 %v289_v28 }
  0x8c   : > { %1241 = vmatprep.mubr.f32.mxu0 %v274_v29  ;;  %1265 = vmatprep.mubr.f32.mxu1 %v290_v30 }
  0x8f   : > { %1242 = vmatmul.mubr.f32.gmra.mrb[2].mxu0 %v275_v31  ;;  %1266 = vmatmul.mubr.f32.gmra.mrb[2].mxu1 %v291_v32 }
  0x90   : > { %1244 = vmatprep.mubr.f32.mxu0 %v276_v33  ;;  %1268 = vmatprep.mubr.f32.mxu1 %v292_v34 }
  0x93   : > { %1245 = vmatmul.mubr.f32.gmra.mrb[4].mxu0 %v277_v35  ;;  %1269 = vmatmul.mubr.f32.gmra.mrb[4].mxu1 %v293_v36 }
  0x94   : > { %1247 = vmatprep.mubr.f32.mxu0 %v278_v37  ;;  %1271 = vmatprep.mubr.f32.mxu1 %v294_v38 }
  0x97   : > { %1248 = vmatmul.mubr.f32.gmra.mrb[6].mxu0 %v279_v39  ;;  %1272 = vmatmul.mubr.f32.gmra.mrb[6].mxu1 %v295_v40 }
  0x98   : > { %1250 = vmatprep.mubr.f32.mxu0 %v280_v41  ;;  %1274 = vmatprep.mubr.f32.mxu1 %v296_v42 }
  0x9b   : > { %1251 = vmatmul.mubr.f32.gmra.mrb[8].mxu0 %v281_v43  ;;  %1275 = vmatmul.mubr.f32.gmra.mrb[8].mxu1 %v297_v44 }
  0x9c   : > { %1253 = vmatprep.mubr.f32.mxu0 %v282_v45  ;;  %1277 = vmatprep.mubr.f32.mxu1 %v298_v46 }
  0x9f   : > { %1254 = vmatmul.mubr.f32.gmra.mrb[10].mxu0 %v283_v47  ;;  %1278 = vmatmul.mubr.f32.gmra.mrb[10].mxu1 %v299_v48 }
  0xa0   : > { %1256 = vmatprep.mubr.f32.mxu0 %v284_v49  ;;  %1280 = vmatprep.mubr.f32.mxu1 %v300_v50 }
  0xa3   : > { %1257 = vmatmul.mubr.f32.gmra.mrb[12].mxu0 %v285_v51  ;;  %1281 = vmatmul.mubr.f32.gmra.mrb[12].mxu1 %v301_v52 }
  0xa4   : > { %1259 = vmatprep.mubr.f32.mxu0 %v286_v53  ;;  %1283 = vmatprep.mubr.f32.mxu1 %v302_v54 }
  0xa7   : > { %1260 = vmatmul.mubr.f32.gmra.mrb[14].mxu0 %v287_v55  ;;  %1284 = vmatmul.mubr.f32.gmra.mrb[14].mxu1 %v303_v56 }
 0x15e   : > { %v1240_v58 = vpop.f32.mrb[0].mxu0  ;;  %v1264_v59 = vpop.f32.mrb[0].mxu1 }
 0x15f   : > { %v399_v60 = vadd.f32 %v1240_v58, %v1821_v57  ;;  %v479_v61 = vadd.f32 %v1264_v59, %v1821_v57  ;;  %v393_v62 = vpop.f32.mrb[1].mxu0  ;;  %v473_v63 = vpop.f32.mrb[1].mxu1 }
 0x160   : > { %v394_v0 = vadd.f32 %v1821_v57, %v393_v62  ;;  %v474_v5 = vadd.f32 %v1821_v57, %v473_v63 }
 0x161   : > { %v553_v2 = vmax.f32 %v399_v60, 0.0  ;;  %v569_v3 = vmax.f32 %v479_v61, 0.0 }
 0x162   : > { %v552_v4 = vmax.f32 %v394_v0, 0.0  ;;  %v1243_v6 = vpop.f32.mrb[2].mxu0  ;;  %v1267_v7 = vpop.f32.mrb[2].mxu1  ;;  %v568_v16 = vmax.f32 %v474_v5, 0.0 }
 0x163   : > { %v409_v8 = vadd.f32 %v1243_v6, %v1821_v57  ;;  %v403_v9 = vpop.f32.mrb[3].mxu0  ;;  %v608_v10 = vmul.f32 %v1829_v1, %v569_v3  ;;  %v489_v11 = vadd.f32 %v1267_v7, %v1821_v57  ;;  %v592_v12 = vmul.f32 %v1829_v1, %v553_v2  ;;  %v483_v13 = vpop.f32.mrb[3].mxu1 }
 0x164   : > { %v404_v19 = vadd.f32 %v1821_v57, %v403_v9  ;;  %v484_v20 = vadd.f32 %v1821_v57, %v483_v13  ;;  %v591_v22 = vmul.f32 %v1829_v1, %v552_v4  ;;  %v607_v32 = vmul.f32 %v1829_v1, %v568_v16 }
 0x165   : > { %v555_v14 = vmax.f32 %v409_v8, 0.0  ;;  %657 = vadd.xlane.f32.xlu1 %v608_v10  ;;  %v571_v15 = vmax.f32 %v489_v11, 0.0  ;;  %625 = vadd.xlane.f32.xlu0 %v592_v12 }
 0x166   : > { %v1246_v17 = vpop.f32.mrb[4].mxu0  ;;  %v1270_v18 = vpop.f32.mrb[4].mxu1  ;;  %v554_v30 = vmax.f32 %v404_v19, 0.0  ;;  %v570_v31 = vmax.f32 %v484_v20, 0.0 }
 0x167   : > { %v594_v21 = vmul.f32 %v1829_v1, %v555_v14  ;;  %v413_v23 = vpop.f32.mrb[5].mxu0  ;;  %v493_v24 = vpop.f32.mrb[5].mxu1  ;;  %v419_v25 = vadd.f32 %v1246_v17, %v1821_v57  ;;  %v610_v26 = vmul.f32 %v1829_v1, %v571_v15  ;;  %v499_v35 = vadd.f32 %v1270_v18, %v1821_v57 }
 0x168   : > { %v414_v27 = vadd.f32 %v1821_v57, %v413_v23  ;;  %v494_v38 = vadd.f32 %v1821_v57, %v493_v24  ;;  %v593_v41 = vmul.f32 %v1829_v1, %v554_v30  ;;  %v609_v42 = vmul.f32 %v1829_v1, %v570_v31 }
 0x169   : > { %629 = vadd.xlane.f32.xlu1 %v594_v21  ;;  %623 = vadd.xlane.f32.xlu0 %v591_v22  ;;  %v557_v36 = vmax.f32 %v419_v25, 0.0  ;;  %v573_v45 = vmax.f32 %v499_v35, 0.0 }
 0x16a   : > { %v1249_v28 = vpop.f32.mrb[6].mxu0  ;;  %v1273_v29 = vpop.f32.mrb[6].mxu1  ;;  %v556_v37 = vmax.f32 %v414_v27, 0.0  ;;  %v572_v47 = vmax.f32 %v494_v38, 0.0 }
 0x16b   : > { %v423_v33 = vpop.f32.mrb[7].mxu0  ;;  %v503_v34 = vpop.f32.mrb[7].mxu1  ;;  %v429_v46 = vadd.f32 %v1249_v28, %v1821_v57  ;;  %v596_v49 = vmul.f32 %v1829_v1, %v557_v36  ;;  %v509_v55 = vadd.f32 %v1273_v29, %v1821_v57  ;;  %v612_v56 = vmul.f32 %v1829_v1, %v573_v45 }
 0x16c   : > { %v424_v48 = vadd.f32 %v1821_v57, %v423_v33  ;;  %v595_v50 = vmul.f32 %v1829_v1, %v556_v37  ;;  %v504_v60 = vadd.f32 %v1821_v57, %v503_v34  ;;  %v611_v61 = vmul.f32 %v1829_v1, %v572_v47 }
 0x16d   : > { %661 = vadd.xlane.f32.xlu1 %v610_v26  ;;  %655 = vadd.xlane.f32.xlu0 %v607_v32  ;;  %v559_v58 = vmax.f32 %v429_v46, 0.0  ;;  %v575_v3 = vmax.f32 %v509_v55, 0.0 }
 0x16e   : > { %v1252_v39 = vpop.f32.mrb[8].mxu0  ;;  %v1276_v40 = vpop.f32.mrb[8].mxu1  ;;  %v558_v59 = vmax.f32 %v424_v48, 0.0  ;;  %v574_v5 = vmax.f32 %v504_v60, 0.0 }
 0x16f   : > { %v433_v43 = vpop.f32.mrb[9].mxu0  ;;  %v513_v44 = vpop.f32.mrb[9].mxu1  ;;  %v439_v4 = vadd.f32 %v1252_v39, %v1821_v57  ;;  %v598_v7 = vmul.f32 %v1829_v1, %v559_v58  ;;  %v519_v13 = vadd.f32 %v1276_v40, %v1821_v57  ;;  %v614_v14 = vmul.f32 %v1829_v1, %v575_v3 }
 0x170   : > { %v434_v6 = vadd.f32 %v1821_v57, %v433_v43  ;;  %v597_v8 = vmul.f32 %v1829_v1, %v558_v59  ;;  %v514_v17 = vadd.f32 %v1821_v57, %v513_v44  ;;  %v613_v18 = vmul.f32 %v1829_v1, %v574_v5 }
 0x171   : > { %627 = vadd.xlane.f32.xlu1 %v593_v41  ;;  %659 = vadd.xlane.f32.xlu0 %v609_v42  ;;  %v561_v15 = vmax.f32 %v439_v4, 0.0  ;;  %v577_v19 = vmax.f32 %v519_v13, 0.0 }
 0x172   : > { %v1255_v51 = vpop.f32.mrb[10].mxu0  ;;  %v1279_v52 = vpop.f32.mrb[10].mxu1  ;;  %v560_v16 = vmax.f32 %v434_v6, 0.0  ;;  %v576_v21 = vmax.f32 %v514_v17, 0.0 }
 0x173   : > { %v443_v53 = vpop.f32.mrb[11].mxu0  ;;  %v523_v54 = vpop.f32.mrb[11].mxu1  ;;  %v449_v20 = vadd.f32 %v1255_v51, %v1821_v57  ;;  %v600_v23 = vmul.f32 %v1829_v1, %v561_v15  ;;  %v529_v25 = vadd.f32 %v1279_v52, %v1821_v57  ;;  %v616_v26 = vmul.f32 %v1829_v1, %v577_v19 }
 0x174   : > { %v444_v22 = vadd.f32 %v1821_v57, %v443_v53  ;;  %v599_v24 = vmul.f32 %v1829_v1, %v560_v16  ;;  %v524_v29 = vadd.f32 %v1821_v57, %v523_v54  ;;  %v615_v30 = vmul.f32 %v1829_v1, %v576_v21 }
 0x175   : > { %633 = vadd.xlane.f32.xlu1 %v596_v49  ;;  %631 = vadd.xlane.f32.xlu0 %v595_v50  ;;  %v563_v27 = vmax.f32 %v449_v20, 0.0  ;;  %v579_v31 = vmax.f32 %v529_v25, 0.0 }
 0x176   : > { %v1258_v62 = vpop.f32.mrb[12].mxu0  ;;  %v1282_v63 = vpop.f32.mrb[12].mxu1  ;;  %v562_v28 = vmax.f32 %v444_v22, 0.0  ;;  %v578_v33 = vmax.f32 %v524_v29, 0.0 }
 0x177   : > { %v453_v0 = vpop.f32.mrb[13].mxu0  ;;  %v533_v2 = vpop.f32.mrb[13].mxu1  ;;  %v459_v32 = vadd.f32 %v1258_v62, %v1821_v57  ;;  %v602_v35 = vmul.f32 %v1829_v1, %v563_v27  ;;  %v539_v37 = vadd.f32 %v1282_v63, %v1821_v57  ;;  %v618_v38 = vmul.f32 %v1829_v1, %v579_v31 }
 0x178   : > { %v454_v34 = vadd.f32 %v1821_v57, %v453_v0  ;;  %v601_v36 = vmul.f32 %v1829_v1, %v562_v28  ;;  %v534_v41 = vadd.f32 %v1821_v57, %v533_v2  ;;  %v617_v42 = vmul.f32 %v1829_v1, %v578_v33 }
 0x179   : > { %665 = vadd.xlane.f32.xlu1 %v612_v56  ;;  %663 = vadd.xlane.f32.xlu0 %v611_v61  ;;  %v565_v39 = vmax.f32 %v459_v32, 0.0  ;;  %v581_v43 = vmax.f32 %v539_v37, 0.0 }
 0x17a   : > { %v1261_v9 = vpop.f32.mrb[14].mxu0  ;;  %v1285_v10 = vpop.f32.mrb[14].mxu1  ;;  %v564_v40 = vmax.f32 %v454_v34, 0.0  ;;  %v580_v45 = vmax.f32 %v534_v41, 0.0 }
 0x17b   : > { %v463_v11 = vpop.f32.mrb[15].mxu0  ;;  %v543_v12 = vpop.f32.mrb[15].mxu1  ;;  %v469_v44 = vadd.f32 %v1261_v9, %v1821_v57  ;;  %v604_v47 = vmul.f32 %v1829_v1, %v565_v39  ;;  %v549_v49 = vadd.f32 %v1285_v10, %v1821_v57  ;;  %v620_v50 = vmul.f32 %v1829_v1, %v581_v43 }
 0x17c   : > { %v464_v46 = vadd.f32 %v1821_v57, %v463_v11  ;;  %v603_v48 = vmul.f32 %v1829_v1, %v564_v40  ;;  %v544_v53 = vadd.f32 %v1821_v57, %v543_v12  ;;  %v619_v54 = vmul.f32 %v1829_v1, %v580_v45  ;;  %v1892_v57 = vld [vmem:[#allocation2] ss:$0 sm:$0xff] }
 0x17d   : > { %637 = vadd.xlane.f32.xlu1 %v598_v7  ;;  %635 = vadd.xlane.f32.xlu0 %v597_v8  ;;  %v567_v51 = vmax.f32 %v469_v44, 0.0  ;;  %v583_v55 = vmax.f32 %v549_v49, 0.0 }
 0x17e   : > { %v566_v52 = vmax.f32 %v464_v46, 0.0  ;;  %v582_v56 = vmax.f32 %v544_v53, 0.0 }
 0x17f   : > { %v606_v58 = vmul.f32 %v1829_v1, %v567_v51  ;;  %v622_v60 = vmul.f32 %v1829_v1, %v583_v55 }
 0x180   : > { %v605_v59 = vmul.f32 %v1829_v1, %v566_v52  ;;  %v621_v61 = vmul.f32 %v1829_v1, %v582_v56 }
 0x181   : > { %669 = vadd.xlane.f32.xlu1 %v614_v14  ;;  %667 = vadd.xlane.f32.xlu0 %v613_v18 }
 0x185   : > { %641 = vadd.xlane.f32.xlu1 %v600_v23  ;;  %639 = vadd.xlane.f32.xlu0 %v599_v24 }
 0x189   : > { %673 = vadd.xlane.f32.xlu1 %v616_v26  ;;  %671 = vadd.xlane.f32.xlu0 %v615_v30 }
 0x18d   : > { %645 = vadd.xlane.f32.xlu1 %v602_v35  ;;  %643 = vadd.xlane.f32.xlu0 %v601_v36 }
 0x191   : > { %677 = vadd.xlane.f32.xlu1 %v618_v38  ;;  %675 = vadd.xlane.f32.xlu0 %v617_v42 }
 0x195   : > { %649 = vadd.xlane.f32.xlu1 %v604_v47  ;;  %647 = vadd.xlane.f32.xlu0 %v603_v48 }
 0x199   : > { %681 = vadd.xlane.f32.xlu1 %v620_v50  ;;  %679 = vadd.xlane.f32.xlu0 %v619_v54 }
 0x19d   : > { %653 = vadd.xlane.f32.xlu1 %v606_v58  ;;  %651 = vadd.xlane.f32.xlu0 %v605_v59 }
 0x1a1   : > { %685 = vadd.xlane.f32.xlu1 %v622_v60  ;;  %683 = vadd.xlane.f32.xlu0 %v621_v61 }
 0x1f2   : > { %v658_v62 = vpop.xlane.xlu1 %657  ;;  %v626_v63 = vpop.xlane.xlu0 %625 }
 0x1f3   : > { %v711_v0 = vadd.f32 %v1892_v57, %v658_v62  ;;  %v695_v2 = vadd.f32 %v1892_v57, %v626_v63 }
 0x1f5   : > { %744 = vst.msk [vmem:[%s1897_s16 + $0x88] sm:$0xff] %vm726_vm0, %v711_v0  ;;  %728 = vst.msk [vmem:[%s1897_s16 + $0x8] sm:$0xff] %vm726_vm0, %v695_v2 }
 0x1f6   : > { %v630_v1 = vpop.xlane.xlu1 %629  ;;  %v624_v3 = vpop.xlane.xlu0 %623 }
 0x1f7   : > { %v697_v4 = vadd.f32 %v1892_v57, %v630_v1  ;;  %v694_v5 = vadd.f32 %v1892_v57, %v624_v3 }
 0x1f9   : > { %730 = vst.msk [vmem:[%s1897_s16 + $0x18] sm:$0xff] %vm726_vm0, %v697_v4  ;;  %727 = vst.msk [vmem:[%s1897_s16] sm:$0xff] %vm726_vm0, %v694_v5 }
 0x1fa   : > { %v662_v6 = vpop.xlane.xlu1 %661  ;;  %v656_v7 = vpop.xlane.xlu0 %655 }
 0x1fb   : > { %v713_v8 = vadd.f32 %v1892_v57, %v662_v6  ;;  %v710_v9 = vadd.f32 %v1892_v57, %v656_v7 }
 0x1fd   : > { %746 = vst.msk [vmem:[%s1897_s16 + $0x98] sm:$0xff] %vm726_vm0, %v713_v8  ;;  %743 = vst.msk [vmem:[%s1897_s16 + $0x80] sm:$0xff] %vm726_vm0, %v710_v9 }
 0x1fe   : > { %v628_v10 = vpop.xlane.xlu1 %627  ;;  %v660_v11 = vpop.xlane.xlu0 %659 }
 0x1ff   : > { %v696_v12 = vadd.f32 %v1892_v57, %v628_v10  ;;  %v712_v13 = vadd.f32 %v1892_v57, %v660_v11 }
 0x201   : > { %729 = vst.msk [vmem:[%s1897_s16 + $0x10] sm:$0xff] %vm726_vm0, %v696_v12  ;;  %745 = vst.msk [vmem:[%s1897_s16 + $0x90] sm:$0xff] %vm726_vm0, %v712_v13 }
 0x202   : > { %v634_v14 = vpop.xlane.xlu1 %633  ;;  %v632_v15 = vpop.xlane.xlu0 %631 }
 0x203   : > { %v699_v16 = vadd.f32 %v1892_v57, %v634_v14  ;;  %v698_v17 = vadd.f32 %v1892_v57, %v632_v15 }
 0x205   : > { %732 = vst.msk [vmem:[%s1897_s16 + $0x28] sm:$0xff] %vm726_vm0, %v699_v16  ;;  %731 = vst.msk [vmem:[%s1897_s16 + $0x20] sm:$0xff] %vm726_vm0, %v698_v17 }
 0x206   : > { %v666_v18 = vpop.xlane.xlu1 %665  ;;  %v664_v19 = vpop.xlane.xlu0 %663 }
 0x207   : > { %v715_v20 = vadd.f32 %v1892_v57, %v666_v18  ;;  %v714_v21 = vadd.f32 %v1892_v57, %v664_v19 }
 0x209   : > { %748 = vst.msk [vmem:[%s1897_s16 + $0xa8] sm:$0xff] %vm726_vm0, %v715_v20  ;;  %747 = vst.msk [vmem:[%s1897_s16 + $0xa0] sm:$0xff] %vm726_vm0, %v714_v21 }
 0x20a   : > { %v638_v22 = vpop.xlane.xlu1 %637  ;;  %v636_v23 = vpop.xlane.xlu0 %635 }
 0x20b   : > { %v701_v24 = vadd.f32 %v1892_v57, %v638_v22  ;;  %v700_v25 = vadd.f32 %v1892_v57, %v636_v23 }
 0x20d   : > { %734 = vst.msk [vmem:[%s1897_s16 + $0x38] sm:$0xff] %vm726_vm0, %v701_v24  ;;  %733 = vst.msk [vmem:[%s1897_s16 + $0x30] sm:$0xff] %vm726_vm0, %v700_v25 }
 0x20e   : > { %v670_v26 = vpop.xlane.xlu1 %669  ;;  %v668_v27 = vpop.xlane.xlu0 %667 }
 0x20f   : > { %v717_v28 = vadd.f32 %v1892_v57, %v670_v26  ;;  %v716_v29 = vadd.f32 %v1892_v57, %v668_v27 }
 0x211   : > { %750 = vst.msk [vmem:[%s1897_s16 + $0xb8] sm:$0xff] %vm726_vm0, %v717_v28  ;;  %749 = vst.msk [vmem:[%s1897_s16 + $0xb0] sm:$0xff] %vm726_vm0, %v716_v29 }
 0x212   : > { %v642_v30 = vpop.xlane.xlu1 %641  ;;  %v640_v31 = vpop.xlane.xlu0 %639 }
 0x213   : > { %v703_v32 = vadd.f32 %v1892_v57, %v642_v30  ;;  %v702_v33 = vadd.f32 %v1892_v57, %v640_v31 }
 0x215   : > { %736 = vst.msk [vmem:[%s1897_s16 + $0x48] sm:$0xff] %vm726_vm0, %v703_v32  ;;  %735 = vst.msk [vmem:[%s1897_s16 + $0x40] sm:$0xff] %vm726_vm0, %v702_v33 }
 0x216   : > { %v674_v34 = vpop.xlane.xlu1 %673  ;;  %v672_v35 = vpop.xlane.xlu0 %671 }
 0x217   : > { %v719_v36 = vadd.f32 %v1892_v57, %v674_v34  ;;  %v718_v37 = vadd.f32 %v1892_v57, %v672_v35 }
 0x219   : > { %752 = vst.msk [vmem:[%s1897_s16 + $0xc8] sm:$0xff] %vm726_vm0, %v719_v36  ;;  %751 = vst.msk [vmem:[%s1897_s16 + $0xc0] sm:$0xff] %vm726_vm0, %v718_v37 }
 0x21a   : > { %v646_v38 = vpop.xlane.xlu1 %645  ;;  %v644_v39 = vpop.xlane.xlu0 %643 }
 0x21b   : > { %v705_v40 = vadd.f32 %v1892_v57, %v646_v38  ;;  %v704_v41 = vadd.f32 %v1892_v57, %v644_v39 }
 0x21d   : > { %738 = vst.msk [vmem:[%s1897_s16 + $0x58] sm:$0xff] %vm726_vm0, %v705_v40  ;;  %737 = vst.msk [vmem:[%s1897_s16 + $0x50] sm:$0xff] %vm726_vm0, %v704_v41 }
 0x21e   : > { %v678_v42 = vpop.xlane.xlu1 %677  ;;  %v676_v43 = vpop.xlane.xlu0 %675 }
 0x21f   : > { %v721_v44 = vadd.f32 %v1892_v57, %v678_v42  ;;  %v720_v45 = vadd.f32 %v1892_v57, %v676_v43 }
 0x221   : > { %754 = vst.msk [vmem:[%s1897_s16 + $0xd8] sm:$0xff] %vm726_vm0, %v721_v44  ;;  %753 = vst.msk [vmem:[%s1897_s16 + $0xd0] sm:$0xff] %vm726_vm0, %v720_v45 }
 0x222   : > { %v650_v46 = vpop.xlane.xlu1 %649  ;;  %v648_v47 = vpop.xlane.xlu0 %647 }
 0x223   : > { %v707_v48 = vadd.f32 %v1892_v57, %v650_v46  ;;  %v706_v49 = vadd.f32 %v1892_v57, %v648_v47 }
 0x225   : > { %740 = vst.msk [vmem:[%s1897_s16 + $0x68] sm:$0xff] %vm726_vm0, %v707_v48  ;;  %739 = vst.msk [vmem:[%s1897_s16 + $0x60] sm:$0xff] %vm726_vm0, %v706_v49 }
 0x226   : > { %v682_v50 = vpop.xlane.xlu1 %681  ;;  %v680_v51 = vpop.xlane.xlu0 %679 }
 0x227   : > { %v723_v52 = vadd.f32 %v1892_v57, %v682_v50  ;;  %v722_v53 = vadd.f32 %v1892_v57, %v680_v51 }
 0x229   : > { %756 = vst.msk [vmem:[%s1897_s16 + $0xe8] sm:$0xff] %vm726_vm0, %v723_v52  ;;  %755 = vst.msk [vmem:[%s1897_s16 + $0xe0] sm:$0xff] %vm726_vm0, %v722_v53 }
 0x22a   : > { %v654_v54 = vpop.xlane.xlu1 %653  ;;  %v652_v55 = vpop.xlane.xlu0 %651 }
 0x22b   : > { %v709_v56 = vadd.f32 %v1892_v57, %v654_v54  ;;  %v708_v58 = vadd.f32 %v1892_v57, %v652_v55  ;;  %765 = sbr.rel (!%p2154_p6) target bundleno = 618 (0x26a), region = 52 }
 0x22d   : > { %742 = vst.msk [vmem:[%s1897_s16 + $0x78] sm:$0xff] %vm726_vm0, %v709_v56  ;;  %741 = vst.msk [vmem:[%s1897_s16 + $0x70] sm:$0xff] %vm726_vm0, %v708_v58 }
 0x22e   : > { %v686_v59 = vpop.xlane.xlu1 %685  ;;  %v684_v60 = vpop.xlane.xlu0 %683 }
 0x22f   : > { %v725_v61 = vadd.f32 %v1892_v57, %v686_v59  ;;  %v724_v62 = vadd.f32 %v1892_v57, %v684_v60 }
 0x231   : > { %758 = vst.msk [vmem:[%s1897_s16 + $0xf8] sm:$0xff] %vm726_vm0, %v725_v61  ;;  %757 = vst.msk [vmem:[%s1897_s16 + $0xf0] sm:$0xff] %vm726_vm0, %v724_v62 }
 0x232   : > { %s2167_s23 = smov (!%p768_p7, %s767_s23), 32 }
 0x233   : > { %s1139_s10 = sshll.u32 %s2167_s23, 7 }
 0x234   : > { %p1142_p9 = scmp.eq.s32.totalorder %s1139_s10, 0 }
 0x235   : > { %s2006_s30 = sshrl.u32 (!%p1142_p9), %s2167_s23, 5 }
 0x236   : > { %776 = sbr.rel (%p1142_p9) target bundleno = 618 (0x26a), region = 56  ;;  %p1143_p12 = scmp.le.s32.totalorder (!%p1142_p9), %s2006_s30, 0 }
 0x23d   : > { %1063 = sbr.rel (%p1143_p12) target bundleno = 597 (0x255), region = 138  ;;  %s2155_s4 = smov (!%p1143_p12), %s2000_s7 }
 0x23e   : > { %s2156_s11 = smov (!%p1143_p12), %s1897_s16  ;;  %s2015_s9 = smov (!%p1143_p12), 0  }
 0x23f   : > { %s2017_s8 = smov (!%p1143_p12), 0  }
 0x244 LB: >> { %v900_v57 = vld [vmem:[%s1580_s11] sm:$0xff]  ;;  %v902_v63 = vld [vmem:[%s1580_s11 + $0x8] sm:$0xff]  ;;  %v904_v0 = vld [vmem:[%s1580_s11 + $0x10] sm:$0xff]  ;;  %s964_s28 = sadd.s32 1, %s1584_s9  ;;  %s894_s8 = sadd.s32 1, %s1588_s8   ;;  %s1588_s8 = sphi %s2017_s8, %s894_s8   ;;  %s1584_s9 = sphi %s2015_s9, %s2159_s9   ;;  %s1580_s11 = sphi %s2156_s11, %s2158_s11   ;;  %s1576_s4 = sphi %s2155_s4, %s2157_s4  }
 0x245   : >> { %901 = vst [vmem:[%s1576_s4] sm:$0xff] %v900_v57  ;;  %903 = vst [vmem:[%s1576_s4 + $0x8] sm:$0xff] %v902_v63  ;;  %v906_v2 = vld [vmem:[%s1580_s11 + $0x18] sm:$0xff]  ;;  %v908_v1 = vld [vmem:[%s1580_s11 + $0x20] sm:$0xff]  ;;  %p965_p0 = scmp.ge.s32.totalorder %s964_s28, %s2006_s30  ;;  %p893_p2 = scmp.ge.s32.totalorder %s894_s8, %s2006_s30 }
 0x246   : >> { %905 = vst [vmem:[%s1576_s4 + $0x10] sm:$0xff] %v904_v0  ;;  %v910_v3 = vld [vmem:[%s1580_s11 + $0x28] sm:$0xff]  ;;  %907 = vst [vmem:[%s1576_s4 + $0x18] sm:$0xff] %v906_v2  ;;  %v912_v4 = vld [vmem:[%s1580_s11 + $0x30] sm:$0xff] }
 0x247   : >> { %909 = vst [vmem:[%s1576_s4 + $0x20] sm:$0xff] %v908_v1  ;;  %911 = vst [vmem:[%s1576_s4 + $0x28] sm:$0xff] %v910_v3  ;;  %v914_v5 = vld [vmem:[%s1580_s11 + $0x38] sm:$0xff]  ;;  %v916_v6 = vld [vmem:[%s1580_s11 + $0x40] sm:$0xff]  ;;  %s2169_s28 = smov (%p965_p0, %s964_s28), 0 }
 0x248   : >> { %913 = vst [vmem:[%s1576_s4 + $0x30] sm:$0xff] %v912_v4  ;;  %915 = vst [vmem:[%s1576_s4 + $0x38] sm:$0xff] %v914_v5  ;;  %v918_v7 = vld [vmem:[%s1580_s11 + $0x48] sm:$0xff]  ;;  %v920_v8 = vld [vmem:[%s1580_s11 + $0x50] sm:$0xff]  ;;  %s1144_s14 = sshll.u32 %s2169_s28, 8  ;;  %s2159_s9 = smov %s2169_s28 }
 0x249   : >> { %917 = vst [vmem:[%s1576_s4 + $0x40] sm:$0xff] %v916_v6  ;;  %v922_v9 = vld [vmem:[%s1580_s11 + $0x58] sm:$0xff]  ;;  %919 = vst [vmem:[%s1576_s4 + $0x48] sm:$0xff] %v918_v7  ;;  %v924_v10 = vld [vmem:[%s1580_s11 + $0x60] sm:$0xff]  ;;  %s2073_s15 = scalar_lea.vmem %s1897_s16, %s1144_s14 [#allocation7]   ;;  %s970_s18 = scalar_lea.vmem %s2000_s7, %s1144_s14  }
 0x24a   : >> { %921 = vst [vmem:[%s1576_s4 + $0x50] sm:$0xff] %v920_v8  ;;  %923 = vst [vmem:[%s1576_s4 + $0x58] sm:$0xff] %v922_v9  ;;  %v926_v11 = vld [vmem:[%s1580_s11 + $0x68] sm:$0xff]  ;;  %v928_v12 = vld [vmem:[%s1580_s11 + $0x70] sm:$0xff] }
 0x24b   : >> { %925 = vst [vmem:[%s1576_s4 + $0x60] sm:$0xff] %v924_v10  ;;  %927 = vst [vmem:[%s1576_s4 + $0x68] sm:$0xff] %v926_v11  ;;  %v930_v13 = vld [vmem:[%s1580_s11 + $0x78] sm:$0xff]  ;;  %v932_v14 = vld [vmem:[%s1580_s11 + $0x80] sm:$0xff] }
 0x24c   : >> { %929 = vst [vmem:[%s1576_s4 + $0x70] sm:$0xff] %v928_v12  ;;  %v934_v15 = vld [vmem:[%s1580_s11 + $0x88] sm:$0xff]  ;;  %931 = vst [vmem:[%s1576_s4 + $0x78] sm:$0xff] %v930_v13  ;;  %v936_v16 = vld [vmem:[%s1580_s11 + $0x90] sm:$0xff] }
 0x24d   : >> { %933 = vst [vmem:[%s1576_s4 + $0x80] sm:$0xff] %v932_v14  ;;  %935 = vst [vmem:[%s1576_s4 + $0x88] sm:$0xff] %v934_v15  ;;  %v938_v17 = vld [vmem:[%s1580_s11 + $0x98] sm:$0xff]  ;;  %v940_v18 = vld [vmem:[%s1580_s11 + $0xa0] sm:$0xff] }
 0x24e   : >> { %937 = vst [vmem:[%s1576_s4 + $0x90] sm:$0xff] %v936_v16  ;;  %939 = vst [vmem:[%s1576_s4 + $0x98] sm:$0xff] %v938_v17  ;;  %v942_v19 = vld [vmem:[%s1580_s11 + $0xa8] sm:$0xff]  ;;  %v944_v20 = vld [vmem:[%s1580_s11 + $0xb0] sm:$0xff]  ;;  %896 = sbr.rel (!%p893_p2) target bundleno = 580 (0x244), region = 144 }
 0x24f   : >> { %941 = vst [vmem:[%s1576_s4 + $0xa0] sm:$0xff] %v940_v18  ;;  %v946_v21 = vld [vmem:[%s1580_s11 + $0xb8] sm:$0xff]  ;;  %943 = vst [vmem:[%s1576_s4 + $0xa8] sm:$0xff] %v942_v19  ;;  %v948_v22 = vld [vmem:[%s1580_s11 + $0xc0] sm:$0xff] }
 0x250   : >> { %945 = vst [vmem:[%s1576_s4 + $0xb0] sm:$0xff] %v944_v20  ;;  %947 = vst [vmem:[%s1576_s4 + $0xb8] sm:$0xff] %v946_v21  ;;  %v950_v23 = vld [vmem:[%s1580_s11 + $0xc8] sm:$0xff]  ;;  %v952_v24 = vld [vmem:[%s1580_s11 + $0xd0] sm:$0xff] }
 0x251   : >> { %949 = vst [vmem:[%s1576_s4 + $0xc0] sm:$0xff] %v948_v22  ;;  %951 = vst [vmem:[%s1576_s4 + $0xc8] sm:$0xff] %v950_v23  ;;  %v954_v25 = vld [vmem:[%s1580_s11 + $0xd8] sm:$0xff]  ;;  %v956_v26 = vld [vmem:[%s1580_s11 + $0xe0] sm:$0xff] }
 0x252   : >> { %953 = vst [vmem:[%s1576_s4 + $0xd0] sm:$0xff] %v952_v24  ;;  %v958_v27 = vld [vmem:[%s1580_s11 + $0xe8] sm:$0xff]  ;;  %955 = vst [vmem:[%s1576_s4 + $0xd8] sm:$0xff] %v954_v25  ;;  %v960_v28 = vld [vmem:[%s1580_s11 + $0xf0] sm:$0xff] }
 0x253   : >> { %957 = vst [vmem:[%s1576_s4 + $0xe0] sm:$0xff] %v956_v26  ;;  %959 = vst [vmem:[%s1576_s4 + $0xe8] sm:$0xff] %v958_v27  ;;  %v962_v29 = vld [vmem:[%s1580_s11 + $0xf8] sm:$0xff]  ;;  %s2158_s11 = smov %s2073_s15 }
 0x254   : >> { %961 = vst [vmem:[%s1576_s4 + $0xf0] sm:$0xff] %v960_v28  ;;  %963 = vst [vmem:[%s1576_s4 + $0xf8] sm:$0xff] %v962_v29  ;;  %s2157_s4 = smov %s970_s18 }
 0x255 PF: > { %s2114_s19 = sand.u32 31, %s2167_s23   ;;  %s1156_s29 = sshll.u32 %s2006_s30, 8 }
 0x256   : > { %s975_s6 = scalar_lea.vmem %s1897_s16, %s1156_s29 [#allocation7]   ;;  %s977_s12 = scalar_lea.vmem %s2000_s7, %s1156_s29  }
 0x257   : > { %p1149_p4 = scmp.le.s32.totalorder %s2114_s19, 0 }
 0x258   : > { %s1590_s13 = smov (!%p1149_p4), %s977_s12   ;;  %s1594_s17 = smov (!%p1149_p4), %s975_s6  }
 0x259   : > { %1077 = sbr.rel (%p1149_p4) target bundleno = 618 (0x26a), region = 149  ;;  %s1598_s20 = smov (!%p1149_p4), 0  }
 0x25a   : > { %s1602_s25 = smov (!%p1149_p4), 0  }
 0x260 LB: >> { %v987_v30 = vld [vmem:[%s1596_s17] sm:$0xff]  ;;  %s989_s23 = sadd.s32 1, %s1600_s20  ;;  %s981_s25 = sadd.s32 1, %s1604_s25   ;;  %s1604_s25 = sphi %s1602_s25, %s981_s25   ;;  %s1600_s20 = sphi %s1598_s20, %s1599_s20   ;;  %s1596_s17 = sphi %s1594_s17, %s994_s17   ;;  %s1592_s13 = sphi %s1590_s13, %s995_s13  }
 0x261   : >> { %988 = vst [vmem:[%s1592_s13] sm:$0xff] %v987_v30  ;;  %p990_p8 = scmp.ge.s32.totalorder %s989_s23, %s2114_s19  ;;  %p980_p10 = scmp.ge.s32.totalorder %s981_s25, %s2114_s19 }
 0x263   : >> { %s2171_s23 = smov (%p990_p8, %s989_s23), 0  ;;  %983 = sbr.rel (!%p980_p10) target bundleno = 608 (0x260), region = 155 }
 0x264   : >> { %s1150_s16 = sshll.u32 %s2171_s23, 3  ;;  %s1599_s20 = smov %s2171_s23  }
 0x265   : >> { %s994_s17 = scalar_lea.vmem %s975_s6, %s1150_s16 [#allocation7]   ;;  %s995_s13 = scalar_lea.vmem %s977_s12, %s1150_s16  }
 0x26a PF: > { %p18_p13 = scmp.ge.s32.totalorder %s1667_s24, 4   ;;  %s2160_s20 = smov %s1564_s21 }
 0x26b   : > { %s2161_s21 = smov %s1568_s22  ;;  %s2162_s22 = smov %s1677_s27 }
 0x26c   : > { %s2163_s23 = smov %s1667_s24  ;;  %20 = sbr.rel (!%p18_p13) target bundleno = 7 (0x7), region = 166 }
 0x273   :  { %1011 = vsyncpa [#allocation4], 1 }
 0x274   :  { %1013 = vsyncpa [#allocation4 + $0x1], 1 }
 0x275   :  { %1014 = vsyncpa [#allocation6], 1 }

</bundles_post_ra>
